<compile_context>
chip_gen: v6e
topology: v6e:2x2x1
jax: 0.10.0
libtpu: 0.0.40
codegen_flags: <defaults>
</compile_context>

<pallas_src>
import functools

import jax
import jax.numpy as jnp
from jax.experimental import pallas as pl
from jax.experimental.pallas import tpu as pltpu


_LOGITS_BLOCK_BUDGET = 4 * 1024 * 1024   # target bytes per (double-buffered) logits block
_MAX_RESIDENT_BYTES = 48 * 1024 * 1024   # hard cap (v7x has 64 MiB physical VMEM)


def _round_up(x, m):
    return -(-x // m) * m


def _pick_tile(num_pixels, num_classes, itemsize, num_batches):
    """Lane (pixel) tile width for a (C, tile) logits block.

    Block last dim must be a multiple of 128 or equal to the full extent; the
    double-buffered footprint must stay well under v7x's 64 MiB VMEM."""
    bytes_per_col = max(1, num_classes * itemsize)
    tile = max(128, (_LOGITS_BLOCK_BUDGET // bytes_per_col) // 128 * 128)
    if num_batches == 1 and num_pixels >= 4 * 128:
        # Keep >= 4 pixel blocks so the parallel grid axis can be sharded
        # across both TensorCores on v7x.
        quarter = _round_up(-(-num_pixels // 4), 128)
        tile = min(tile, max(128, quarter))
    if tile >= num_pixels:
        return num_pixels            # full-extent block: always layout-legal
    return tile


def _ce_kernel(logits_ref, labels_ref, loss_ref, *,
               ignore_index, num_pixels, mask_tail):
    """Per-tile (unweighted) softmax cross-entropy, classes on sublanes."""
    x = logits_ref[0].astype(jnp.float32)                 # (C, T) classes x pixels
    lbl = labels_ref[0]                                   # (1, T) int32
    c, t = x.shape

    # Sublane-only iota broadcast-compared against the lane-resident labels.
    class_ids = jax.lax.broadcasted_iota(jnp.int32, (c, 1), 0)
    hit = class_ids == lbl                                # (C, T) bool

    # Numerically stable per-pixel log-sum-exp (reduction over sublanes).
    col_max = jnp.max(x, axis=0, keepdims=True)                              # (1, T)
    lse = col_max + jnp.log(jnp.sum(jnp.exp(x - col_max), axis=0, keepdims=True))

    # Logit at the label -- no float one-hot materialized.
    picked = jnp.sum(jnp.where(hit, x, 0.0), axis=0, keepdims=True)          # (1, T)

    valid = lbl != ignore_index
    if mask_tail:
        # Only the last (partial) pixel tile needs OOB masking.
        pix = pl.program_id(1) * t + jax.lax.broadcasted_iota(jnp.int32, (1, t), 1)
        valid = valid & (pix < num_pixels)

    loss_ref[0] = jnp.where(valid, lse - picked, 0.0)                        # (1, T)


def _ce_xla(logits3d, labels3d, ignore_index):
    """Pure-XLA fallback (only used for the huge-C guard)."""
    x = jnp.swapaxes(logits3d, 1, 2).astype(jnp.float32)   # (NB, P, C)
    logp = jax.nn.log_softmax(x, axis=-1)
    lbl = labels3d.reshape(logits3d.shape[0], -1)
    valid = lbl != ignore_index
    safe = jnp.where(valid, lbl, 0)
    nll = -jnp.take_along_axis(logp, safe[..., None], axis=-1)[..., 0]
    return jnp.where(valid, nll, 0.0).reshape(-1)


def _ce_pallas(logits3d, labels3d, ignore_index):
    """Per-element (unweighted) CE loss on (NB, C, P) logits / (NB, 1, P) labels.

    Returns the flattened per-element loss of shape (NB * P,)."""
    NB, C, P = logits3d.shape
    itemsize = jnp.dtype(logits3d.dtype).itemsize
    tile = _pick_tile(P, C, itemsize, NB)

    # Double-buffered footprint of all pipelined blocks (logits + labels + out).
    per_step = C * tile * itemsize + tile * 4 + tile * 4
    resident = 2 * per_step + (2 << 20)
    if resident > _MAX_RESIDENT_BYTES:
        # TODO(synk): LM-head-sized C needs a class-axis grid dimension with an
        # online (running max / running sum-exp) LSE accumulator; fall back to
        # XLA instead of overflowing v7x's 64 MiB VMEM.
        return _ce_xla(logits3d, labels3d, ignore_index)
    vmem_limit = int(min(max(32 * 1024 * 1024, resident), _MAX_RESIDENT_BYTES))

    grid = (NB, pl.cdiv(P, tile))
    kernel = functools.partial(_ce_kernel, ignore_index=ignore_index,
                               num_pixels=P, mask_tail=(P % tile != 0))

    loss = pl.pallas_call(
        kernel,
        out_shape=jax.ShapeDtypeStruct((NB, 1, P), jnp.float32),
        grid_spec=pltpu.PrefetchScalarGridSpec(
            num_scalar_prefetch=0,
            grid=grid,
            in_specs=[
                pl.BlockSpec((1, C, tile), lambda n, p: (n, 0, p)),
                pl.BlockSpec((1, 1, tile), lambda n, p: (n, 0, p)),
            ],
            out_specs=pl.BlockSpec((1, 1, tile), lambda n, p: (n, 0, p)),
        ),
        compiler_params=pltpu.CompilerParams(
            dimension_semantics=("parallel", "parallel"),
            vmem_limit_bytes=vmem_limit),
    )(logits3d, labels3d.astype(jnp.int32))

    return loss.reshape(-1)


class CrossEntropyLoss:
    """JAX/Pallas port of the mmseg softmax cross-entropy loss module.

    Reduction semantics follow mmseg's weight_reduce_loss: 'mean' divides by
    numel (including ignored pixels) unless avg_non_ignore / avg_factor is
    used -- this intentionally differs from torch's weighted-mean."""

    def __init__(self, use_sigmoid=False, use_mask=False, reduction='mean',
                 class_weight=None, loss_weight=1.0, loss_name='loss_ce',
                 avg_non_ignore=False):
        assert use_sigmoid is False and use_mask is False
        # TODO(synk): only the softmax cross-entropy path (use_sigmoid=False,
        # use_mask=False) is implemented; sigmoid / mask variants are not.
        self.reduction = reduction
        self.loss_weight = float(loss_weight)
        self.class_weight = (None if class_weight is None
                             else jnp.asarray(class_weight, jnp.float32))
        self.avg_non_ignore = avg_non_ignore
        self._loss_name = loss_name

    @property
    def loss_name(self):
        return self._loss_name

    def __call__(self, cls_score, label, weight=None, avg_factor=None,
                 reduction_override=None, ignore_index=-100):
        assert reduction_override in (None, 'none', 'mean', 'sum')
        reduction = reduction_override if reduction_override else self.reduction

        if cls_score.ndim == 4:      # NCHW consumed directly -- no transpose.
            N, C, H, W = cls_score.shape
            logits3d = cls_score.reshape(N, C, H * W)
            labels3d = label.reshape(N, 1, H * W)
        elif cls_score.ndim == 2:    # (N, C) classification path.
            # Small wrapper transpose; fine for classification-sized batches.
            N, C = cls_score.shape
            logits3d = cls_score.T.reshape(1, C, N)
            labels3d = label.reshape(1, 1, N)
        else:
            raise ValueError('cls_score must be 2D (N, C) or 4D (N, C, H, W)')

        loss_elems = _ce_pallas(logits3d, labels3d, ignore_index)     # (NB*P,)

        lbl_flat = label.reshape(-1).astype(jnp.int32)
        if self.class_weight is not None:
            # Tiny gather over labels; invalid pixels already contribute 0.
            safe = jnp.where(lbl_flat == ignore_index, 0, lbl_flat)
            loss_elems = loss_elems * jnp.take(self.class_weight, safe)

        if weight is not None:
            loss_elems = loss_elems * weight.reshape(-1).astype(jnp.float32)

        # TODO(synk): for mean/sum, per-tile partial sums could be emitted from
        # the kernel to avoid materializing the per-element loss in HBM.
        if avg_factor is None and self.avg_non_ignore and reduction == 'mean':
            avg_factor = jnp.sum((lbl_flat != ignore_index).astype(jnp.float32))

        numel = loss_elems.shape[0]
        if avg_factor is None:
            if reduction == 'mean':
                loss = jnp.sum(loss_elems) / numel
            elif reduction == 'sum':
                loss = jnp.sum(loss_elems)
            else:  # 'none'
                loss = loss_elems.reshape(label.shape)
        else:
            if reduction == 'mean':
                eps = jnp.finfo(jnp.float32).eps
                loss = jnp.sum(loss_elems) / (avg_factor + eps)
            elif reduction == 'none':
                loss = loss_elems.reshape(label.shape)
            else:
                raise ValueError(
                    'avg_factor can not be used with reduction="sum"')

        return self.loss_weight * loss


def _reference_elems(cls_score, label, class_weight, ignore_index):
    """Pure-JAX reference: F.cross_entropy(reduction='none')."""
    C = cls_score.shape[1]
    x = jnp.transpose(cls_score, (0, 2, 3, 1)).reshape(-1, C).astype(jnp.float32)
    lbl = label.reshape(-1)
    logp = jax.nn.log_softmax(x, axis=-1)
    valid = lbl != ignore_index
    safe = jnp.where(valid, lbl, 0)
    nll = -jnp.take_along_axis(logp, safe[:, None], axis=-1)[:, 0]
    cw = jnp.ones((C,), jnp.float32) if class_weight is None else class_weight[safe]
    cw = cw if class_weight is None else cw
    loss = jnp.where(valid, nll * (1.0 if class_weight is None else class_weight[safe]), 0.0)
    return loss.reshape(label.shape)


if __name__ == "__main__":
    key = jax.random.PRNGKey(0)
    k1, k2, k3 = jax.random.split(key, 3)

    N, C, H, W = 2, 4, 16, 16
    ignore_index = -100

    cls_score = jax.random.normal(k1, (N, C, H, W), dtype=jnp.float32)
    label = jax.random.randint(k2, (N, H, W), 0, C, dtype=jnp.int32)
    ignore_mask = jax.random.uniform(k3, (N, H, W)) < 0.1
    label = jnp.where(ignore_mask, ignore_index, label)

    # --- with class weights, 'mean' and 'none' reductions ---
    class_weight = [1.0, 0.5, 2.0, 1.5]
    cw_arr = jnp.asarray(class_weight, jnp.float32)
    loss_mod = CrossEntropyLoss(reduction='mean', class_weight=class_weight,
                                loss_weight=1.0, avg_non_ignore=False)

    loss = jax.block_until_ready(loss_mod(cls_score, label, ignore_index=ignore_index))
    ref_mean = jnp.mean(_reference_elems(cls_score, label, cw_arr, ignore_index))
    assert jnp.allclose(loss, ref_mean, rtol=1e-4, atol=1e-5), (loss, ref_mean)

    loss_none = jax.block_until_ready(
        loss_mod(cls_score, label, reduction_override='none',
                 ignore_index=ignore_index))
    ref_none = _reference_elems(cls_score, label, cw_arr, ignore_index)
    assert jnp.allclose(loss_none, ref_none, rtol=1e-4, atol=1e-5)

    # --- class_weight=None fast path, avg_non_ignore mean ---
    loss_mod2 = CrossEntropyLoss(reduction='mean', class_weight=None,
                                 loss_weight=1.0, avg_non_ignore=True)
    loss2 = jax.block_until_ready(loss_mod2(cls_score, label, ignore_index=ignore_index))
    ref_elems2 = _reference_elems(cls_score, label, None, ignore_index)
    n_valid = jnp.sum((label != ignore_index).astype(jnp.float32))
    ref2 = jnp.sum(ref_elems2) / (n_valid + jnp.finfo(jnp.float32).eps)
    assert jnp.allclose(loss2, ref2, rtol=1e-4, atol=1e-5), (loss2, ref2)

    print("KERNEL_OK")
</pallas_src>

<mosaic_0001>
module attributes {stable_mosaic.version = 11 : i64} {
  func.func @_ce_kernel(%arg0: i32, %arg1: i32, %arg2: memref<1x4x256xf32, #tpu.memory_space<vmem>>, %arg3: memref<1x1x256xi32, #tpu.memory_space<vmem>>, %arg4: memref<1x1x256xf32, #tpu.memory_space<vmem>>) attributes {dimension_semantics = [#tpu.dimension_semantics<parallel>, #tpu.dimension_semantics<parallel>], iteration_bounds = array<i64: 2, 1>, scalar_prefetch = 0 : i64, scratch_operands = 0 : i64, tpu.core_type = #tpu.core_type<tc>, window_params = [{transform_indices = @transform_0, window_bounds = array<i64: 1, 4, 256>}, {transform_indices = @transform_1, window_bounds = array<i64: 1, 1, 256>}, {transform_indices = @transform_2, window_bounds = array<i64: 1, 1, 256>}]} {
    %c0 = arith.constant 0 : index
    %c0_0 = arith.constant 0 : index
    %c0_1 = arith.constant 0 : index
    %0 = vector.load %arg2[%c0, %c0_0, %c0_1] : memref<1x4x256xf32, #tpu.memory_space<vmem>>, vector<1x4x256xf32>
    %1 = vector.shape_cast %0 : vector<1x4x256xf32> to vector<4x256xf32>
    %c0_2 = arith.constant 0 : index
    %c0_3 = arith.constant 0 : index
    %c0_4 = arith.constant 0 : index
    %2 = vector.load %arg3[%c0_2, %c0_3, %c0_4] : memref<1x1x256xi32, #tpu.memory_space<vmem>>, vector<1x1x256xi32>
    %3 = vector.shape_cast %2 : vector<1x1x256xi32> to vector<1x256xi32>
    %4 = tpu.iota {dimensions = array<i32: 0>} : vector<4x1xi32>
    %5 = vector.broadcast %4 : vector<4x1xi32> to vector<4x256xi32>
    %6 = vector.broadcast %3 : vector<1x256xi32> to vector<4x256xi32>
    %7 = arith.cmpi eq, %5, %6 : vector<4x256xi32>
    %cst = arith.constant dense<0xFF800000> : vector<256xf32>
    %8 = vector.multi_reduction <maximumf>, %1, %cst [0] : vector<4x256xf32> to vector<256xf32>
    %9 = vector.shape_cast %8 : vector<256xf32> to vector<1x256xf32>
    %10 = vector.broadcast %9 : vector<1x256xf32> to vector<4x256xf32>
    %11 = arith.subf %1, %10 : vector<4x256xf32>
    %12 = math.exp %11 : vector<4x256xf32>
    %cst_5 = arith.constant dense<0.000000e+00> : vector<256xf32>
    %13 = vector.multi_reduction <add>, %12, %cst_5 [0] : vector<4x256xf32> to vector<256xf32>
    %14 = vector.shape_cast %13 : vector<256xf32> to vector<1x256xf32>
    %15 = math.log %14 : vector<1x256xf32>
    %16 = arith.addf %9, %15 : vector<1x256xf32>
    %cst_6 = arith.constant 0.000000e+00 : f32
    %17 = vector.broadcast %cst_6 : f32 to vector<4x256xf32>
    %18 = arith.select %7, %1, %17 : vector<4x256xi1>, vector<4x256xf32>
    %cst_7 = arith.constant dense<0.000000e+00> : vector<256xf32>
    %19 = vector.multi_reduction <add>, %18, %cst_7 [0] : vector<4x256xf32> to vector<256xf32>
    %20 = vector.shape_cast %19 : vector<256xf32> to vector<1x256xf32>
    %c-100_i32 = arith.constant -100 : i32
    %21 = vector.broadcast %c-100_i32 : i32 to vector<1x256xi32>
    %22 = arith.cmpi ne, %3, %21 : vector<1x256xi32>
    %23 = arith.subf %16, %20 : vector<1x256xf32>
    %cst_8 = arith.constant 0.000000e+00 : f32
    %24 = vector.broadcast %cst_8 : f32 to vector<1x256xf32>
    %25 = arith.select %22, %23, %24 : vector<1x256xi1>, vector<1x256xf32>
    %c0_9 = arith.constant 0 : index
    %c0_10 = arith.constant 0 : index
    %c0_11 = arith.constant 0 : index
    %26 = vector.load %arg4[%c0_9, %c0_10, %c0_11] : memref<1x1x256xf32, #tpu.memory_space<vmem>>, vector<1x1x256xf32>
    %27 = vector.shape_cast %26 : vector<1x1x256xf32> to vector<1x256xf32>
    %28 = vector.shape_cast %25 : vector<1x256xf32> to vector<1x1x256xf32>
    tpu.vector_store %arg4[%c0_9, %c0_10, %c0_11], %28 {strides = array<i32>} : memref<1x1x256xf32, #tpu.memory_space<vmem>>, vector<1x1x256xf32>,
    return
  }
  func.func @transform_0(%arg0: i32, %arg1: i32) -> (i32, i32, i32) {
    %c0_i32 = arith.constant 0 : i32
    %c0_i32_0 = arith.constant 0 : i32
    return %arg0, %c0_i32, %arg1 : i32, i32, i32
  }
  func.func @transform_1(%arg0: i32, %arg1: i32) -> (i32, i32, i32) {
    %c0_i32 = arith.constant 0 : i32
    %c0_i32_0 = arith.constant 0 : i32
    return %arg0, %c0_i32, %arg1 : i32, i32, i32
  }
  func.func @transform_2(%arg0: i32, %arg1: i32) -> (i32, i32, i32) {
    %c0_i32 = arith.constant 0 : i32
    %c0_i32_0 = arith.constant 0 : i32
    return %arg0, %c0_i32, %arg1 : i32, i32, i32
  }
}

</mosaic_0001>

<bundles_post_ra>
// kernel: tpu_custom_call.1
= control target key start
LH: loop header
LB: loop body
LE: loop exit
PB: predicated region body
PF: predicated region fallthrough
CT: control target
= control target key end

     0   :  { %7 = vsyncpa [#allocation3], 0  ;;  %s900_s0 = inlined_call_operand.hbm [shape: f32[2,4,256], index: 0, kind: input, shape index: {}]   ;;  %s901_s1 = inlined_call_operand.hbm [shape: s32[2,1,256], index: 1, kind: input, shape index: {}]   ;;  %s902_s2 = inlined_call_operand.hbm [shape: f32[2,1,256], index: 2, kind: output, shape index: {}]  }
   0x1   :  { %9 = vsyncpa [#allocation3 + $0x1], 0 }
   0x2   :  { %10 = vsyncpa [#allocation6], 0 }
   0x3   :  { %12 = vsyncpa [#allocation6 + $0x1], 0 }
   0x4   :  { %13 = vsyncpa [#allocation4], 0 }
   0x5   :  { %15 = vsyncpa [#allocation4 + $0x1], 0  ;;  %s713_s9 = smov 0   ;;  %s715_s10 = smov 0  }
   0x6   :  { %s717_s11 = smov 0   ;;  %s719_s12 = smov 0  }
   0x7   :  { %s721_s13 = smov 0   ;;  %s723_s14 = smov 0  }
   0x8 LB: > { %s455_s15 = sadd.s32 4294967295, %s692_s14   ;;  %s456_s16 = sadd.s32 4294967294, %s692_s14   ;;  %s692_s14 = sphi %s723_s14, %s21_s14   ;;  %s688_s13 = sphi %s721_s13, %s914_s13   ;;  %s684_s12 = sphi %s719_s12, %s913_s12   ;;  %s680_s11 = sphi %s717_s11, %s912_s11   ;;  %s676_s10 = sphi %s715_s10, %s911_s10   ;;  %s672_s9 = sphi %s713_s9, %s910_s9  }
   0x9   : > { %s33_s17 = sadd.s32 1, %s688_s13  ;;  %s42_s18 = sadd.s32 1, %s680_s11 }
   0xa   : > { %p35_p0 = scmp.ge.s32.totalorder %s33_s17, 2  ;;  %p49_p1 = scmp.ne.s32.totalorder %s680_s11, %s676_s10 }
   0xb   : > { %p50_p2 = scmp.eq.s32.totalorder %s692_s14, 0  ;;  %p55_p3 = scmp.ne.s32.totalorder %s676_s10, %s672_s9 }
   0xc   : > { %s916_s17 = smov (%p35_p0, %s33_s17), 0  ;;  %p56_p5 = scmp.eq.s32.totalorder %s455_s15, 0 }
   0xd   : > { %p754_p4 = por %p50_p2, %p49_p1  ;;  %s37_s20 = ssub.s32 %s688_s13, %s916_s17 }
   0xe   : > { %p109_p6 = scmp.eq.s32.totalorder %s455_s15, 1  ;;  %p40_p7 = scmp.eq.s32.totalorder %s37_s20, 0 }
   0xf   : > { %p760_p8 = por %p56_p5, %p55_p3  ;;  %p115_p10 = scmp.eq.s32.totalorder %s456_s16, 1 }
  0x10   : > { %p764_p9 = por %p109_p6, %p49_p1  ;;  %p494_p13 = scmp.lt.s32.totalorder %s692_s14, 2 }
  0x11   : > { %s769_s23 = scalar_select %p40_p7, %s680_s11, %s42_s18  }
  0x12   : > { %p771_p11 = por %p115_p10, %p55_p3  ;;  %s778_s25 = sand.u32 1, %s680_s11  }
  0x13   : > { %s459_s26 = sshll.u32 %s778_s25, 3  ;;  %s474_s27 = sshll.u32 %s688_s13, 7 }
  0x14   : > { %s147_s30 = scalar_lea.hbm %s900_s0, %s474_s27  ;;  %s139_s3 = scalar_lea.vmem [#allocation2], %s459_s26 }
  0x15   : > { %s149_s4 = sshll.u32 %s139_s3, 4  ;;  %p787_p0 = pnand %p494_p13, %p754_p4  ;;  %s150_s4 = int_to_ptr.vmem [resolvable:$true] %s149_s4 }
  0x16   : > { %p465_p1 = scmp.ge.s32.totalorder %s692_s14, 1  ;;  %p175_p2 = scmp.lt.s32.totalorder %s692_s14, 3 }
  0x17   : > { %s136_s6 = scalar_lea.sflag [#allocation3], %s778_s25  ;;  %p554_p3 = pneg %p787_p0 }
  0x18   : > { %s565_s7 = scalar_lea.vmem %s150_s4, 128  ;;  %s694_s8 = smov [#allocation2]  }
  0x19   : > { %p566_p5 = scmp.ne.s32.totalorder %s150_s4, %s565_s7  ;;  %s570_s15 = sshll.u32 %s694_s8, 4  ;;  %s571_s15 = int_to_ptr.vmem [resolvable:$false] %s570_s15 }
  0x1a   : > { %s572_s16 = scalar_lea.vmem %s571_s15, 256  ;;  %p573_p4 = scmp.lt.s32.totalorder %s150_s4, %s571_s15 }
  0x1b   : > { %p568_p6 = pnand %p566_p5, %p554_p3  ;;  %p574_p10 = scmp.lt.s32.totalorder %s572_s16, %s565_s7 }
  0x1d   : > { %p569_p7 = pneg %p568_p6  ;;  %p575_p13 = por %p574_p10, %p573_p4 }
  0x1f   : > { %p576_p12 = pnand %p575_p13, %p569_p7 }
  0x21   : > { %579 = shalt.err (!%p576_p12)
}
  0x22   : > { %486 = dma.hbm_to_vmem [thread:$0]  (!%p787_p0), %s147_s30, 128, %s150_s4, %s136_s6  }
  0x23   : > { %p805_p5 = pnand %p465_p1, %p175_p2  ;;  %s462_s19 = sshll.u32 %s778_s25, 1 }
  0x24   : > { %s475_s20 = sshll.u32 %s688_s13, 5  ;;  %s160_s29 = scalar_lea.vmem [#allocation5], %s462_s19 }
  0x25   : > { %s168_s28 = scalar_lea.hbm %s901_s1, %s475_s20  ;;  %s170_s3 = sshll.u32 %s160_s29, 4  ;;  %s171_s3 = int_to_ptr.vmem [resolvable:$true] %s170_s3 }
  0x26   : > { %s157_s7 = scalar_lea.sflag [#allocation6], %s778_s25  ;;  %s593_s8 = scalar_lea.vmem %s171_s3, 32 }
  0x27   : > { %p594_p12 = scmp.ne.s32.totalorder %s171_s3, %s593_s8  ;;  %s695_s30 = smov [#allocation5]  }
  0x28   : > { %s598_s4 = sshll.u32 %s695_s30, 4  ;;  %s599_s4 = int_to_ptr.vmem [resolvable:$false] %s598_s4 }
  0x29   : > { %p596_p6 = pnand %p594_p12, %p554_p3  ;;  %s600_s6 = scalar_lea.vmem %s599_s4, 64 }
  0x2a   : > { %p601_p1 = scmp.lt.s32.totalorder %s171_s3, %s599_s4  ;;  %p602_p2 = scmp.lt.s32.totalorder %s600_s6, %s593_s8 }
  0x2b   : > { %p597_p7 = pneg %p596_p6 }
  0x2c   : > { %p603_p4 = por %p602_p2, %p601_p1 }
  0x2e   : > { %p604_p10 = pnand %p603_p4, %p597_p7 }
  0x30   : > { %607 = shalt.err (!%p604_p10)
}
  0x31   : > { %489 = dma.hbm_to_vmem [thread:$0]  (!%p787_p0), %s168_s28, 32, %s171_s3, %s157_s7  }
  0x32   : > { %179 = sbr.rel (%p805_p5) target bundleno = 150 (0x96), region = 28  ;;  %s823_s25 = sand.u32 (!%p805_p5), 1, %s676_s10  }
  0x33   : > { %s466_s15 = sshll.u32 (!%p805_p5), %s823_s25, 3  ;;  %s182_s16 = scalar_lea.sflag (!%p805_p5), [#allocation3], %s823_s25 }
  0x34   : > { %s185_s19 = scalar_lea.vmem (!%p805_p5), [#allocation2], %s466_s15 }
  0x37   : > { %659 = dma.done.wait (%p760_p8), %s182_s16, 128  }
  0x38   : > { %661 = vsyncadd (%p760_p8), %s182_s16, 4294967168  ;;  %s467_s5 = sshll.u32 %s823_s25, 1  ;;  %s191_s18 = scalar_lea.sflag [#allocation6], %s823_s25 }
  0x39   : > { %s194_s20 = scalar_lea.vmem [#allocation5], %s467_s5 }
  0x3a   : > { %663 = dma.done.wait (%p760_p8), %s191_s18, 32  }
  0x3b   : > { %665 = vsyncadd (%p760_p8), %s191_s18, 4294967264  ;;  %vm240_vm0 = vcmask 1043456   ;;  %v223_v0 = vld [vmem:[%s185_s19] sm:$0xff]  ;;  %v225_v17 = vlaneseq  ;;  %v842_v22 = vld [vmem:[%s194_s20] sm:$0x3]  ;;  %s219_s21 = scalar_lea.vmem [#allocation7], %s467_s5 }
  0x3c   : > { %v238_v1 = vcombine.high %v223_v0, %v223_v0  ;;  %v241_v2 = vsel %vm240_vm0, %v223_v0, -inf  ;;  %v696_v56 = vmov 1966171168   ;;  %s345_s26 = sshll.u32 %s219_s21, 4  ;;  %s476_s27 = sshll.u32 %s684_s12, 5  ;;  %vm301_vm3 = vcmp.ne.s32.totalorder %v842_v22, 4294967196  ;;  %s855_s26 = int_to_ptr.vmem [resolvable:$true] %s345_s26 }
  0x3d   : > { %v242_v3 = vrot.slane %v241_v2, 4  ;;  %v226_v20 = vshrl.u32 %v225_v17, 7  ;;  %v308_v57 = vunpack.c.l.s4 %v696_v56  ;;  %vm325_vm4 = vcmp.lt.s32.totalorder %v225_v17, 256  ;;  %s343_s3 = scalar_lea.hbm %s902_s2, %s476_s27  ;;  %s329_s7 = scalar_lea.sflag [#allocation4], %s823_s25 }
  0x3e   : > { %v248_v4 = vsel %vm240_vm0, %v238_v1, -inf  ;;  %s608_s8 = scalar_lea.vmem %s855_s26, 32  ;;  %s697_s12 = smov [#allocation7]  }
  0x3f   : > { %v243_v5 = vmax.f32 %v241_v2, %v242_v3  ;;  %v249_v6 = vrot.slane %v248_v4, 4  ;;  %v229_v21 = vsub.s32 0, %v226_v20  ;;  %v233_v23 = vsub.s32 1, %v226_v20  ;;  %p609_p8 = scmp.ne.s32.totalorder %s855_s26, %s608_s8  ;;  %s612_s30 = sshll.u32 %s697_s12, 4  ;;  %s613_s30 = int_to_ptr.vmem [resolvable:$false] %s612_s30 }
  0x40   : > { %s614_s4 = scalar_lea.vmem %s613_s30, 64  ;;  %p615_p13 = scmp.lt.s32.totalorder %s855_s26, %s613_s30 }
  0x41   : > { %v244_v7 = vrot.slane %v243_v5, 2  ;;  %v250_v8 = vmax.f32 %v248_v4, %v249_v6  ;;  %v230_v24 = vrot.slane %v842_v22, %v229_v21  ;;  %v234_v25 = vrot.slane %v842_v22, %v233_v23  ;;  %p610_p0 = pnand %p609_p8, %p764_p9  ;;  %p616_p5 = scmp.lt.s32.totalorder %s614_s4, %s608_s8 }
  0x43   : > { %v245_v9 = vmax.f32 %v243_v5, %v244_v7  ;;  %v251_v10 = vrot.slane %v250_v8, 2  ;;  %vm235_vm1 = vcmp.eq.s32.totalorder %v226_v20, %v230_v24  ;;  %vm236_vm2 = vcmp.eq.s32.totalorder %v226_v20, %v234_v25  ;;  %p611_p3 = pneg %p610_p0  ;;  %p617_p12 = por %p616_p5, %p615_p13 }
  0x44   : > { %v285_v30 = vsel %vm235_vm1, %v223_v0, 0.0  ;;  %v286_v34 = vsel %vm236_vm2, %v238_v1, 0.0  ;;  %v309_v1 = vunpack.c.0.s8 %v308_v57 }
  0x45   : > { %v246_v11 = vrot.slane %v245_v9, 1  ;;  %v252_v12 = vmax.f32 %v250_v8, %v251_v10  ;;  %v287_v35 = vsel %vm240_vm0, %v285_v30, 0.0  ;;  %v294_v38 = vsel %vm240_vm0, %v286_v34, 0.0  ;;  %p618_p6 = pnand %p617_p12, %p611_p3 }
  0x46   : > { %v288_v41 = vrot.slane %v287_v35, 4  ;;  %v295_v44 = vrot.slane %v294_v38, 4  ;;  %v312_v5 = vsub.s32 %v309_v1, %v226_v20 }
  0x47   : > { %v247_v13 = vmax.f32 %v245_v9, %v246_v11  ;;  %v253_v14 = vrot.slane %v252_v12, 1 }
  0x48   : > { %v289_v47 = vadd.f32 %v288_v41, %v287_v35  ;;  %v296_v49 = vadd.f32 %v295_v44, %v294_v38 }
  0x49   : > { %v254_v15 = vmax.f32 %v252_v12, %v253_v14 }
  0x4a   : > { %v290_v50 = vrot.slane %v289_v47, 2  ;;  %v297_v51 = vrot.slane %v296_v49, 2 }
  0x4b   : > { %v257_v16 = vcombine.low %v247_v13, %v254_v15 }
  0x4c   : > { %v291_v52 = vadd.f32 %v290_v50, %v289_v47  ;;  %v298_v53 = vadd.f32 %v297_v51, %v296_v49 }
  0x4d   : > { %v259_v18 = vsub.f32 %v223_v0, %v257_v16 }
  0x4e   : > { %v292_v54 = vrot.slane %v291_v52, 1  ;;  %v299_v55 = vrot.slane %v298_v53, 1 }
  0x4f   : > { %v260_v19 = vmul.f32 1.442695, %v259_v18 }
  0x50   : > { %v293_v60 = vadd.f32 %v292_v54, %v291_v52  ;;  %v300_v0 = vadd.f32 %v299_v55, %v298_v53 }
  0x51   : > { %546 = vpow2.f32 %v260_v19 }
  0x5e   : > { %v547_v26 = vpop.eup %546 }
  0x5f   : > { %v263_v27 = vcombine.high %v547_v26, %v547_v26  ;;  %v265_v28 = vsel %vm240_vm0, %v547_v26, 0.0 }
  0x60   : > { %v266_v29 = vrot.slane %v265_v28, 4 }
  0x61   : > { %v272_v31 = vsel %vm240_vm0, %v263_v27, 0.0 }
  0x62   : > { %v267_v32 = vadd.f32 %v266_v29, %v265_v28  ;;  %v273_v33 = vrot.slane %v272_v31, 4 }
  0x64   : > { %v268_v36 = vrot.slane %v267_v32, 2  ;;  %v274_v37 = vadd.f32 %v273_v33, %v272_v31 }
  0x66   : > { %v269_v39 = vadd.f32 %v268_v36, %v267_v32  ;;  %v275_v40 = vrot.slane %v274_v37, 2 }
  0x68   : > { %v270_v42 = vrot.slane %v269_v39, 1  ;;  %v276_v43 = vadd.f32 %v275_v40, %v274_v37 }
  0x6a   : > { %v271_v45 = vadd.f32 %v270_v42, %v269_v39  ;;  %v277_v46 = vrot.slane %v276_v43, 1 }
  0x6c   : > { %v278_v48 = vadd.f32 %v277_v46, %v276_v43  ;;  %548 = vlog2.f32 %v271_v45 }
  0x6e   : > { %550 = vlog2.f32 %v278_v48 }
  0x79   : > { %v549_v58 = vpop.eup %548 }
  0x7a   : > { %v280_v59 = vmul.f32 0.6931472, %v549_v58 }
  0x7b   : > { %v551_v61 = vpop.eup %550 }
  0x7c   : > { %v282_v62 = vmul.f32 0.6931472, %v551_v61  ;;  %v283_v63 = vadd.f32 %v280_v59, %v247_v13 }
  0x7e   : > { %v284_v2 = vadd.f32 %v282_v62, %v254_v15  ;;  %v302_v3 = vsub.f32 %v283_v63, %v293_v60 }
  0x80   : > { %v303_v4 = vsub.f32 %v284_v2, %v300_v0 }
  0x82   : > { %v306_v6 = vcombine.low %v302_v3, %v303_v4 }
  0x84   : > { %v313_v7 = vrot.slane %v306_v6, %v312_v5 }
  0x86   : > { %v320_v8 = vrot.slane %v313_v7, %v312_v5 }
  0x88   : > { %v322_v9 = vsel %vm301_vm3, %v320_v8, 0.0 }
  0x89   : > { %327 = vst.msk [vmem:[%s219_s21] sm:$0x3] %vm325_vm4, %v322_v9 }
  0x8a   : > { %621 = shalt.err (!%p618_p6)
}
  0x8b   : > { %s622_s6 = scalar_lea.hbm %s343_s3, 32  ;;  %s626_s16 = scalar_lea.hbm %s902_s2, 64 }
  0x8c   : > { %p623_p7 = scmp.ne.s32.totalorder %s343_s3, %s622_s6  ;;  %p627_p4 = scmp.lt.s32.totalorder %s343_s3, %s902_s2 }
  0x8d   : > { %p628_p10 = scmp.lt.s32.totalorder %s626_s16, %s622_s6 }
  0x8e   : > { %p624_p1 = pnand %p623_p7, %p764_p9 }
  0x8f   : > { %p629_p8 = por %p628_p10, %p627_p4 }
  0x90   : > { %p625_p2 = pneg %p624_p1 }
  0x92   : > { %p630_p0 = pnand %p629_p8, %p625_p2 }
  0x94   : > { %633 = shalt.err (!%p630_p0)
}
  0x95   : > { %481 = dma.vmem_to_hbm [thread:$0]  (%p764_p9), %s855_s26, 32, %s343_s3, %s329_s7  }
  0x96 PF: > { %s357_s18 = sand.u32 1, %s672_s9   ;;  %p909_p3 = scmp.ge.s32.totalorder %s692_s14, 2 }
  0x97   : > { %s358_s20 = scalar_lea.sflag [#allocation4], %s357_s18 }
  0x98   : > { %p491_p13 = pnand %p909_p3, %p771_p11 }
  0x9a   : > { %p492_p5 = pneg %p491_p13 }
  0x9c   : > { %667 = dma.done.wait (%p492_p5), %s358_s20, 32  }
  0x9d   : > { %669 = vsyncadd (%p492_p5), %s358_s20, 4294967264  ;;  %s21_s14 = sadd.s32 1, %s692_s14   ;;  %s910_s9 = smov %s676_s10 }
  0x9e   : > { %p18_p12 = scmp.ge.s32.totalorder %s21_s14, 4   ;;  %s911_s10 = smov %s680_s11 }
  0x9f   : > { %s912_s11 = smov %s769_s23  ;;  %s913_s12 = smov %s688_s13 }
  0xa0   : > { %s914_s13 = smov %s916_s17  ;;  %20 = sbr.rel (!%p18_p12) target bundleno = 8 (0x8), region = 86 }
  0xa5   :  { %363 = vsyncpa [#allocation3], 1 }
  0xa6   :  { %365 = vsyncpa [#allocation3 + $0x1], 1 }
  0xa7   :  { %366 = vsyncpa [#allocation6], 1 }
  0xa8   :  { %368 = vsyncpa [#allocation6 + $0x1], 1 }
  0xa9   :  { %369 = vsyncpa [#allocation4], 1 }
  0xaa   :  { %371 = vsyncpa [#allocation4 + $0x1], 1 }

</bundles_post_ra>
